<compile_context>
chip_gen: v6e
topology: v6e:2x2x1
jax: 0.10.0
libtpu: 0.0.40
codegen_flags: <defaults>
</compile_context>

<pallas_src>
import functools

import jax
import jax.numpy as jnp
from jax import lax
from jax.experimental import pallas as pl
from jax.experimental.pallas import tpu as pltpu


# ----------------------------------------------------------------------------
# Pallas kernel: one grid step processes bb batch elements.
#   x_ref   : (C, bb*HW)   channel-major slab of bb batch elements
#   wt_ref  : (L, C)       token_coef_conv weight (bias cancels in softmax)
#   wfv_ref : (CT, C)      wf[:, :C] @ wv
#   wcb_ref : (CT, HW)     folded PosEncoder branch + all biases
#   out_ref : (CT, bb*L)   lane-dense output slab
# ----------------------------------------------------------------------------
def static_tokenizer_kernel(x_ref, wt_ref, wfv_ref, wcb_ref, out_ref):
    x = x_ref[...]                              # (C, bb*HW)
    wt = wt_ref[...]                            # (L, C)
    wfv = wfv_ref[...]                          # (CT, C)
    wcb = wcb_ref[...]                          # (CT, HW)

    hw = wcb_ref.shape[1]
    bb = x_ref.shape[1] // hw
    num_tok = wt_ref.shape[0]                   # L

    # Two lane-dense matmuls over the whole bb-block (issued once per step).
    coef = jnp.dot(wt, x, preferred_element_type=jnp.float32)    # (L, bb*HW)
    g = jnp.dot(wfv, x, preferred_element_type=jnp.float32)      # (CT, bb*HW)

    # Per-element work: softmax over HW + one small contraction.  Static
    # unroll; all weight loads / broadcasts are hoisted above.
    for i in range(bb):
        lo = i * hw
        c_i = coef[:, lo:lo + hw]                                 # (L, HW)
        c_i = c_i - jnp.max(c_i, axis=-1, keepdims=True)
        e = jnp.exp(c_i)
        s_i = e * pl.reciprocal(jnp.sum(e, axis=-1, keepdims=True))  # (L, HW)

        g_i = g[:, lo:lo + hw] + wcb                              # (CT, HW)
        # out_i[c, l] = sum_q g_i[c, q] * s_i[l, q]   (contract last dims)
        o_i = lax.dot_general(g_i, s_i, (((1,), (1,)), ((), ())),
                              preferred_element_type=jnp.float32)  # (CT, L)
        out_ref[:, i * num_tok:(i + 1) * num_tok] = o_i.astype(out_ref.dtype)


# ----------------------------------------------------------------------------
# Bilinear interpolation (align_corners=True) as a constant matrix.
# ----------------------------------------------------------------------------
def bilinear_matrix_1d(out_size, in_size):
    """Row-stochastic matrix implementing 1-D bilinear interp, align_corners=True."""
    if out_size == 1:
        pos = jnp.zeros((1,), jnp.float32)
    else:
        pos = jnp.arange(out_size, dtype=jnp.float32) * (in_size - 1) / (out_size - 1)
    lo = jnp.clip(jnp.floor(pos).astype(jnp.int32), 0, in_size - 1)
    hi = jnp.clip(lo + 1, 0, in_size - 1)
    w_hi = pos - lo.astype(jnp.float32)
    w_lo = 1.0 - w_hi
    eye = jnp.eye(in_size, dtype=jnp.float32)
    return w_lo[:, None] * eye[lo] + w_hi[:, None] * eye[hi]


def make_interp_matrix(desire_size, input_size):
    Mh = bilinear_matrix_1d(desire_size[0], input_size[0])   # (Hd, H)
    Mw = bilinear_matrix_1d(desire_size[1], input_size[1])   # (Wd, W)
    # M[p=i*Wd+j, q=h*W+w] = Mh[i,h] * Mw[j,w]
    return jnp.kron(Mh, Mw)                                   # (HdWd, HW)


def init_params(key, C, L, Cp, CT, desire_size):
    HdWd = desire_size[0] * desire_size[1]
    ks = jax.random.split(key, 8)
    return {
        "wt": 0.1 * jax.random.normal(ks[0], (L, C), jnp.float32),
        "bt": 0.1 * jax.random.normal(ks[1], (L, 1), jnp.float32),
        "wv": 0.1 * jax.random.normal(ks[2], (C, C), jnp.float32),
        "bv": 0.1 * jax.random.normal(ks[3], (C, 1), jnp.float32),
        "wp": 0.1 * jax.random.normal(ks[4], (Cp, HdWd), jnp.float32),
        "bp": 0.1 * jax.random.normal(ks[5], (Cp, 1), jnp.float32),
        "wf": 0.1 * jax.random.normal(ks[6], (CT, C + Cp), jnp.float32),
        "bf": 0.1 * jax.random.normal(ks[7], (CT, 1), jnp.float32),
    }


# ----------------------------------------------------------------------------
# Constant folding (exact algebra — validated against the unfolded reference).
# ----------------------------------------------------------------------------
def fold_params(params, interp_mat, C):
    wf_tok = params["wf"][:, :C]                                  # (CT, C)
    wf_pos = params["wf"][:, C:]                                  # (CT, Cp)
    wfv = wf_tok @ params["wv"]                                   # (CT, C)
    wc = wf_pos @ (params["wp"] @ interp_mat)                     # (CT, HW)
    # Softmax rows sum to 1 over HW, so every bias contributes a constant
    # column to the output; fold them all into the wc term.
    bias = params["bf"] + wf_tok @ params["bv"] + wf_pos @ params["bp"]  # (CT, 1)
    wcb = wc + bias                                               # (CT, HW)
    return wfv, wcb


def _pick_block_batch(bn, c, hw, ntok, max_block_bytes=1 << 20):
    """Largest divisor of bn giving lane-aligned x/out blocks, >=2 grid steps
    when possible (v7x megacore + pipelining), and an x block <= ~1 MiB."""
    def lane_ok(d):
        return (((d * hw) % 128 == 0) or d == bn) and \
               (((d * ntok) % 128 == 0) or d == bn)
    divs = [d for d in range(1, bn + 1) if bn % d == 0]
    for want_multi_step in (True, False):
        cands = [d for d in divs
                 if lane_ok(d)
                 and d * c * hw * 4 <= max_block_bytes
                 and (not want_multi_step or bn // d >= 2 or bn == 1)]
        if cands:
            return max(cands)
    return bn   # always-legal fallback: full-extent block, single grid step


# ----------------------------------------------------------------------------
# Wrapper: layout plumbing + pallas_call.
# ----------------------------------------------------------------------------
@functools.partial(jax.jit, static_argnames=("bb",))
def static_tokenizer(x, params, interp_mat, bb=None):
    B, N, C, H, W = x.shape
    BN, HW = B * N, H * W
    L = params["wt"].shape[0]
    CT = params["wf"].shape[0]

    # Channel-major, batch-flattened x so in-kernel matmuls are lane-dense.
    x_cm = x.reshape(BN, C, HW).transpose(1, 0, 2).reshape(C, BN * HW)

    wfv, wcb = fold_params(params, interp_mat, C)
    wt = params["wt"]

    if bb is None:
        bb = _pick_block_batch(BN, C, HW, L)
    assert BN % bb == 0, (BN, bb)
    grid = (BN // bb,)

    def full_spec(arr):
        nd = arr.ndim
        return pl.BlockSpec(arr.shape, lambda b, _nd=nd: (0,) * _nd)

    out = pl.pallas_call(
        static_tokenizer_kernel,
        out_shape=jax.ShapeDtypeStruct((CT, BN * L), x.dtype),
        grid=grid,
        in_specs=[
            pl.BlockSpec((C, bb * HW), lambda b: (0, b)),
            full_spec(wt), full_spec(wfv), full_spec(wcb),
        ],
        out_specs=pl.BlockSpec((CT, bb * L), lambda b: (0, b)),
        compiler_params=pltpu.CompilerParams(
            dimension_semantics=("parallel",)),
    )(x_cm, wt, wfv, wcb)

    # (CT, BN*L) -> (BN, CT, L): back to the module's output layout.
    return out.reshape(CT, BN, L).transpose(1, 0, 2)


# ----------------------------------------------------------------------------
# Pure-JAX reference using the ORIGINAL (unfolded) parameters.  Validates both
# the kernel and the constant-fold algebra against the module's math.
# ----------------------------------------------------------------------------
def reference(x, params, interp_mat):
    B, N, C, H, W = x.shape
    xf = x.reshape(B * N, C, H * W)
    coef = jnp.einsum("lc,bcq->blq", params["wt"], xf) + params["bt"][None]
    s = jax.nn.softmax(coef, axis=-1)                      # softmax over HW
    value = jnp.einsum("dc,bcq->bdq", params["wv"], xf) + params["bv"][None]
    tokens = jnp.einsum("bdq,blq->bdl", value, s)
    s_interp = jnp.einsum("pq,blq->blp", interp_mat, s)
    pos = jnp.einsum("cp,blp->bcl", params["wp"], s_interp) + params["bp"][None]
    cat = jnp.concatenate([tokens, pos], axis=1)
    return jnp.einsum("tk,bkl->btl", params["wf"], cat) + params["bf"][None]


if __name__ == "__main__":
    # Small shapes consistent with the module's forward; HW = 128 and BN = 16
    # so blocks are naturally lane-aligned and the grid has 2 steps.
    B, N, C, H, W = 4, 4, 8, 8, 16         # x: (B, N, C, H, W), HW = 128
    L, Cp, CT = 16, 8, 16
    input_size = (4, 4)                    # PosEncoder desire_size (!= (H, W))

    key = jax.random.PRNGKey(0)
    kx, kp = jax.random.split(key)
    x = jax.random.normal(kx, (B, N, C, H, W), jnp.float32)
    params = init_params(kp, C, L, Cp, CT, input_size)
    interp_mat = make_interp_matrix(input_size, (H, W))    # (HdWd, HW)

    out = static_tokenizer(x, params, interp_mat)
    out = jax.block_until_ready(out)

    ref = reference(x, params, interp_mat)
    assert out.shape == (B * N, CT, L), out.shape
    assert jnp.allclose(out, ref, atol=1e-4, rtol=1e-4), \
        float(jnp.max(jnp.abs(out - ref)))

    print("KERNEL_OK")
</pallas_src>

<mosaic_0001>
module attributes {stable_mosaic.version = 11 : i64} {
  func.func @static_tokenizer_kernel(%arg0: i32, %arg1: memref<8x1024xf32, #tpu.memory_space<vmem>>, %arg2: memref<16x8xf32, #tpu.memory_space<vmem>>, %arg3: memref<16x8xf32, #tpu.memory_space<vmem>>, %arg4: memref<16x128xf32, #tpu.memory_space<vmem>>, %arg5: memref<16x128xf32, #tpu.memory_space<vmem>>) attributes {dimension_semantics = [#tpu.dimension_semantics<parallel>], iteration_bounds = array<i64: 2>, scalar_prefetch = 0 : i64, scratch_operands = 0 : i64, tpu.core_type = #tpu.core_type<tc>, window_params = [{transform_indices = @transform_0, window_bounds = array<i64: 8, 1024>}, {pipeline_mode = #tpu.pipeline_mode<synchronous>, transform_indices = @transform_1, window_bounds = array<i64: 16, 8>}, {pipeline_mode = #tpu.pipeline_mode<synchronous>, transform_indices = @transform_2, window_bounds = array<i64: 16, 8>}, {pipeline_mode = #tpu.pipeline_mode<synchronous>, transform_indices = @transform_3, window_bounds = array<i64: 16, 128>}, {transform_indices = @transform_4, window_bounds = array<i64: 16, 128>}]} {
    %c0 = arith.constant 0 : index
    %c0_0 = arith.constant 0 : index
    %0 = vector.load %arg1[%c0, %c0_0] : memref<8x1024xf32, #tpu.memory_space<vmem>>, vector<8x1024xf32>
    %c0_1 = arith.constant 0 : index
    %c0_2 = arith.constant 0 : index
    %1 = vector.load %arg2[%c0_1, %c0_2] : memref<16x8xf32, #tpu.memory_space<vmem>>, vector<16x8xf32>
    %c0_3 = arith.constant 0 : index
    %c0_4 = arith.constant 0 : index
    %2 = vector.load %arg3[%c0_3, %c0_4] : memref<16x8xf32, #tpu.memory_space<vmem>>, vector<16x8xf32>
    %c0_5 = arith.constant 0 : index
    %c0_6 = arith.constant 0 : index
    %3 = vector.load %arg4[%c0_5, %c0_6] : memref<16x128xf32, #tpu.memory_space<vmem>>, vector<16x128xf32>
    %cst = arith.constant dense<0.000000e+00> : vector<16x1024xf32>
    %4 = tpu.matmul %1, %0, %cst {dimension_numbers = #tpu.dot_dimension_numbers<[1], [0], [0], [1], [0, 0, 1, 1], [], []>} : vector<16x8xf32>, vector<8x1024xf32>, vector<16x1024xf32> -> vector<16x1024xf32>
    %cst_7 = arith.constant dense<0.000000e+00> : vector<16x1024xf32>
    %5 = tpu.matmul %2, %0, %cst_7 {dimension_numbers = #tpu.dot_dimension_numbers<[1], [0], [0], [1], [0, 0, 1, 1], [], []>} : vector<16x8xf32>, vector<8x1024xf32>, vector<16x1024xf32> -> vector<16x1024xf32>
    %6 = vector.extract_strided_slice %4 {offsets = [0, 0], sizes = [16, 128], strides = [1, 1]} : vector<16x1024xf32> to vector<16x128xf32>
    %cst_8 = arith.constant dense<0xFF800000> : vector<16xf32>
    %7 = vector.multi_reduction <maximumf>, %6, %cst_8 [1] : vector<16x128xf32> to vector<16xf32>
    %8 = vector.shape_cast %7 : vector<16xf32> to vector<16x1xf32>
    %9 = vector.broadcast %8 : vector<16x1xf32> to vector<16x128xf32>
    %10 = arith.subf %6, %9 : vector<16x128xf32>
    %11 = math.exp %10 : vector<16x128xf32>
    %cst_9 = arith.constant dense<0.000000e+00> : vector<16xf32>
    %12 = vector.multi_reduction <add>, %11, %cst_9 [1] : vector<16x128xf32> to vector<16xf32>
    %13 = vector.shape_cast %12 : vector<16xf32> to vector<16x1xf32>
    %14 = tpu.reciprocal %13 : vector<16x1xf32> -> vector<16x1xf32>
    %15 = vector.broadcast %14 : vector<16x1xf32> to vector<16x128xf32>
    %16 = arith.mulf %11, %15 : vector<16x128xf32>
    %17 = vector.extract_strided_slice %5 {offsets = [0, 0], sizes = [16, 128], strides = [1, 1]} : vector<16x1024xf32> to vector<16x128xf32>
    %18 = arith.addf %17, %3 : vector<16x128xf32>
    %cst_10 = arith.constant dense<0.000000e+00> : vector<16x16xf32>
    %19 = tpu.matmul %18, %16, %cst_10 {dimension_numbers = #tpu.dot_dimension_numbers<[1], [1], [0], [0], [0, 0, 1, 0], [], []>} : vector<16x128xf32>, vector<16x128xf32>, vector<16x16xf32> -> vector<16x16xf32>
    %c0_11 = arith.constant 0 : index
    %c0_12 = arith.constant 0 : index
    %20 = vector.load %arg5[%c0_11, %c0_12] : memref<16x128xf32, #tpu.memory_space<vmem>>, vector<16x16xf32>
    tpu.vector_store %arg5[%c0_11, %c0_12], %19 {strides = array<i32>} : memref<16x128xf32, #tpu.memory_space<vmem>>, vector<16x16xf32>,
    %21 = vector.extract_strided_slice %4 {offsets = [0, 128], sizes = [16, 128], strides = [1, 1]} : vector<16x1024xf32> to vector<16x128xf32>
    %cst_13 = arith.constant dense<0xFF800000> : vector<16xf32>
    %22 = vector.multi_reduction <maximumf>, %21, %cst_13 [1] : vector<16x128xf32> to vector<16xf32>
    %23 = vector.shape_cast %22 : vector<16xf32> to vector<16x1xf32>
    %24 = vector.broadcast %23 : vector<16x1xf32> to vector<16x128xf32>
    %25 = arith.subf %21, %24 : vector<16x128xf32>
    %26 = math.exp %25 : vector<16x128xf32>
    %cst_14 = arith.constant dense<0.000000e+00> : vector<16xf32>
    %27 = vector.multi_reduction <add>, %26, %cst_14 [1] : vector<16x128xf32> to vector<16xf32>
    %28 = vector.shape_cast %27 : vector<16xf32> to vector<16x1xf32>
    %29 = tpu.reciprocal %28 : vector<16x1xf32> -> vector<16x1xf32>
    %30 = vector.broadcast %29 : vector<16x1xf32> to vector<16x128xf32>
    %31 = arith.mulf %26, %30 : vector<16x128xf32>
    %32 = vector.extract_strided_slice %5 {offsets = [0, 128], sizes = [16, 128], strides = [1, 1]} : vector<16x1024xf32> to vector<16x128xf32>
    %33 = arith.addf %32, %3 : vector<16x128xf32>
    %cst_15 = arith.constant dense<0.000000e+00> : vector<16x16xf32>
    %34 = tpu.matmul %33, %31, %cst_15 {dimension_numbers = #tpu.dot_dimension_numbers<[1], [1], [0], [0], [0, 0, 1, 0], [], []>} : vector<16x128xf32>, vector<16x128xf32>, vector<16x16xf32> -> vector<16x16xf32>
    %c0_16 = arith.constant 0 : index
    %c16 = arith.constant 16 : index
    %35 = vector.load %arg5[%c0_16, %c16] : memref<16x128xf32, #tpu.memory_space<vmem>>, vector<16x16xf32>
    tpu.vector_store %arg5[%c0_16, %c16], %34 {strides = array<i32>} : memref<16x128xf32, #tpu.memory_space<vmem>>, vector<16x16xf32>,
    %36 = vector.extract_strided_slice %4 {offsets = [0, 256], sizes = [16, 128], strides = [1, 1]} : vector<16x1024xf32> to vector<16x128xf32>
    %cst_17 = arith.constant dense<0xFF800000> : vector<16xf32>
    %37 = vector.multi_reduction <maximumf>, %36, %cst_17 [1] : vector<16x128xf32> to vector<16xf32>
    %38 = vector.shape_cast %37 : vector<16xf32> to vector<16x1xf32>
    %39 = vector.broadcast %38 : vector<16x1xf32> to vector<16x128xf32>
    %40 = arith.subf %36, %39 : vector<16x128xf32>
    %41 = math.exp %40 : vector<16x128xf32>
    %cst_18 = arith.constant dense<0.000000e+00> : vector<16xf32>
    %42 = vector.multi_reduction <add>, %41, %cst_18 [1] : vector<16x128xf32> to vector<16xf32>
    %43 = vector.shape_cast %42 : vector<16xf32> to vector<16x1xf32>
    %44 = tpu.reciprocal %43 : vector<16x1xf32> -> vector<16x1xf32>
    %45 = vector.broadcast %44 : vector<16x1xf32> to vector<16x128xf32>
    %46 = arith.mulf %41, %45 : vector<16x128xf32>
    %47 = vector.extract_strided_slice %5 {offsets = [0, 256], sizes = [16, 128], strides = [1, 1]} : vector<16x1024xf32> to vector<16x128xf32>
    %48 = arith.addf %47, %3 : vector<16x128xf32>
    %cst_19 = arith.constant dense<0.000000e+00> : vector<16x16xf32>
    %49 = tpu.matmul %48, %46, %cst_19 {dimension_numbers = #tpu.dot_dimension_numbers<[1], [1], [0], [0], [0, 0, 1, 0], [], []>} : vector<16x128xf32>, vector<16x128xf32>, vector<16x16xf32> -> vector<16x16xf32>
    %c0_20 = arith.constant 0 : index
    %c32 = arith.constant 32 : index
    %50 = vector.load %arg5[%c0_20, %c32] : memref<16x128xf32, #tpu.memory_space<vmem>>, vector<16x16xf32>
    tpu.vector_store %arg5[%c0_20, %c32], %49 {strides = array<i32>} : memref<16x128xf32, #tpu.memory_space<vmem>>, vector<16x16xf32>,
    %51 = vector.extract_strided_slice %4 {offsets = [0, 384], sizes = [16, 128], strides = [1, 1]} : vector<16x1024xf32> to vector<16x128xf32>
    %cst_21 = arith.constant dense<0xFF800000> : vector<16xf32>
    %52 = vector.multi_reduction <maximumf>, %51, %cst_21 [1] : vector<16x128xf32> to vector<16xf32>
    %53 = vector.shape_cast %52 : vector<16xf32> to vector<16x1xf32>
    %54 = vector.broadcast %53 : vector<16x1xf32> to vector<16x128xf32>
    %55 = arith.subf %51, %54 : vector<16x128xf32>
    %56 = math.exp %55 : vector<16x128xf32>
    %cst_22 = arith.constant dense<0.000000e+00> : vector<16xf32>
    %57 = vector.multi_reduction <add>, %56, %cst_22 [1] : vector<16x128xf32> to vector<16xf32>
    %58 = vector.shape_cast %57 : vector<16xf32> to vector<16x1xf32>
    %59 = tpu.reciprocal %58 : vector<16x1xf32> -> vector<16x1xf32>
    %60 = vector.broadcast %59 : vector<16x1xf32> to vector<16x128xf32>
    %61 = arith.mulf %56, %60 : vector<16x128xf32>
    %62 = vector.extract_strided_slice %5 {offsets = [0, 384], sizes = [16, 128], strides = [1, 1]} : vector<16x1024xf32> to vector<16x128xf32>
    %63 = arith.addf %62, %3 : vector<16x128xf32>
    %cst_23 = arith.constant dense<0.000000e+00> : vector<16x16xf32>
    %64 = tpu.matmul %63, %61, %cst_23 {dimension_numbers = #tpu.dot_dimension_numbers<[1], [1], [0], [0], [0, 0, 1, 0], [], []>} : vector<16x128xf32>, vector<16x128xf32>, vector<16x16xf32> -> vector<16x16xf32>
    %c0_24 = arith.constant 0 : index
    %c48 = arith.constant 48 : index
    %65 = vector.load %arg5[%c0_24, %c48] : memref<16x128xf32, #tpu.memory_space<vmem>>, vector<16x16xf32>
    tpu.vector_store %arg5[%c0_24, %c48], %64 {strides = array<i32>} : memref<16x128xf32, #tpu.memory_space<vmem>>, vector<16x16xf32>,
    %66 = vector.extract_strided_slice %4 {offsets = [0, 512], sizes = [16, 128], strides = [1, 1]} : vector<16x1024xf32> to vector<16x128xf32>
    %cst_25 = arith.constant dense<0xFF800000> : vector<16xf32>
    %67 = vector.multi_reduction <maximumf>, %66, %cst_25 [1] : vector<16x128xf32> to vector<16xf32>
    %68 = vector.shape_cast %67 : vector<16xf32> to vector<16x1xf32>
    %69 = vector.broadcast %68 : vector<16x1xf32> to vector<16x128xf32>
    %70 = arith.subf %66, %69 : vector<16x128xf32>
    %71 = math.exp %70 : vector<16x128xf32>
    %cst_26 = arith.constant dense<0.000000e+00> : vector<16xf32>
    %72 = vector.multi_reduction <add>, %71, %cst_26 [1] : vector<16x128xf32> to vector<16xf32>
    %73 = vector.shape_cast %72 : vector<16xf32> to vector<16x1xf32>
    %74 = tpu.reciprocal %73 : vector<16x1xf32> -> vector<16x1xf32>
    %75 = vector.broadcast %74 : vector<16x1xf32> to vector<16x128xf32>
    %76 = arith.mulf %71, %75 : vector<16x128xf32>
    %77 = vector.extract_strided_slice %5 {offsets = [0, 512], sizes = [16, 128], strides = [1, 1]} : vector<16x1024xf32> to vector<16x128xf32>
    %78 = arith.addf %77, %3 : vector<16x128xf32>
    %cst_27 = arith.constant dense<0.000000e+00> : vector<16x16xf32>
    %79 = tpu.matmul %78, %76, %cst_27 {dimension_numbers = #tpu.dot_dimension_numbers<[1], [1], [0], [0], [0, 0, 1, 0], [], []>} : vector<16x128xf32>, vector<16x128xf32>, vector<16x16xf32> -> vector<16x16xf32>
    %c0_28 = arith.constant 0 : index
    %c64 = arith.constant 64 : index
    %80 = vector.load %arg5[%c0_28, %c64] : memref<16x128xf32, #tpu.memory_space<vmem>>, vector<16x16xf32>
    tpu.vector_store %arg5[%c0_28, %c64], %79 {strides = array<i32>} : memref<16x128xf32, #tpu.memory_space<vmem>>, vector<16x16xf32>,
    %81 = vector.extract_strided_slice %4 {offsets = [0, 640], sizes = [16, 128], strides = [1, 1]} : vector<16x1024xf32> to vector<16x128xf32>
    %cst_29 = arith.constant dense<0xFF800000> : vector<16xf32>
    %82 = vector.multi_reduction <maximumf>, %81, %cst_29 [1] : vector<16x128xf32> to vector<16xf32>
    %83 = vector.shape_cast %82 : vector<16xf32> to vector<16x1xf32>
    %84 = vector.broadcast %83 : vector<16x1xf32> to vector<16x128xf32>
    %85 = arith.subf %81, %84 : vector<16x128xf32>
    %86 = math.exp %85 : vector<16x128xf32>
    %cst_30 = arith.constant dense<0.000000e+00> : vector<16xf32>
    %87 = vector.multi_reduction <add>, %86, %cst_30 [1] : vector<16x128xf32> to vector<16xf32>
    %88 = vector.shape_cast %87 : vector<16xf32> to vector<16x1xf32>
    %89 = tpu.reciprocal %88 : vector<16x1xf32> -> vector<16x1xf32>
    %90 = vector.broadcast %89 : vector<16x1xf32> to vector<16x128xf32>
    %91 = arith.mulf %86, %90 : vector<16x128xf32>
    %92 = vector.extract_strided_slice %5 {offsets = [0, 640], sizes = [16, 128], strides = [1, 1]} : vector<16x1024xf32> to vector<16x128xf32>
    %93 = arith.addf %92, %3 : vector<16x128xf32>
    %cst_31 = arith.constant dense<0.000000e+00> : vector<16x16xf32>
    %94 = tpu.matmul %93, %91, %cst_31 {dimension_numbers = #tpu.dot_dimension_numbers<[1], [1], [0], [0], [0, 0, 1, 0], [], []>} : vector<16x128xf32>, vector<16x128xf32>, vector<16x16xf32> -> vector<16x16xf32>
    %c0_32 = arith.constant 0 : index
    %c80 = arith.constant 80 : index
    %95 = vector.load %arg5[%c0_32, %c80] : memref<16x128xf32, #tpu.memory_space<vmem>>, vector<16x16xf32>
    tpu.vector_store %arg5[%c0_32, %c80], %94 {strides = array<i32>} : memref<16x128xf32, #tpu.memory_space<vmem>>, vector<16x16xf32>,
    %96 = vector.extract_strided_slice %4 {offsets = [0, 768], sizes = [16, 128], strides = [1, 1]} : vector<16x1024xf32> to vector<16x128xf32>
    %cst_33 = arith.constant dense<0xFF800000> : vector<16xf32>
    %97 = vector.multi_reduction <maximumf>, %96, %cst_33 [1] : vector<16x128xf32> to vector<16xf32>
    %98 = vector.shape_cast %97 : vector<16xf32> to vector<16x1xf32>
    %99 = vector.broadcast %98 : vector<16x1xf32> to vector<16x128xf32>
    %100 = arith.subf %96, %99 : vector<16x128xf32>
    %101 = math.exp %100 : vector<16x128xf32>
    %cst_34 = arith.constant dense<0.000000e+00> : vector<16xf32>
    %102 = vector.multi_reduction <add>, %101, %cst_34 [1] : vector<16x128xf32> to vector<16xf32>
    %103 = vector.shape_cast %102 : vector<16xf32> to vector<16x1xf32>
    %104 = tpu.reciprocal %103 : vector<16x1xf32> -> vector<16x1xf32>
    %105 = vector.broadcast %104 : vector<16x1xf32> to vector<16x128xf32>
    %106 = arith.mulf %101, %105 : vector<16x128xf32>
    %107 = vector.extract_strided_slice %5 {offsets = [0, 768], sizes = [16, 128], strides = [1, 1]} : vector<16x1024xf32> to vector<16x128xf32>
    %108 = arith.addf %107, %3 : vector<16x128xf32>
    %cst_35 = arith.constant dense<0.000000e+00> : vector<16x16xf32>
    %109 = tpu.matmul %108, %106, %cst_35 {dimension_numbers = #tpu.dot_dimension_numbers<[1], [1], [0], [0], [0, 0, 1, 0], [], []>} : vector<16x128xf32>, vector<16x128xf32>, vector<16x16xf32> -> vector<16x16xf32>
    %c0_36 = arith.constant 0 : index
    %c96 = arith.constant 96 : index
    %110 = vector.load %arg5[%c0_36, %c96] : memref<16x128xf32, #tpu.memory_space<vmem>>, vector<16x16xf32>
    tpu.vector_store %arg5[%c0_36, %c96], %109 {strides = array<i32>} : memref<16x128xf32, #tpu.memory_space<vmem>>, vector<16x16xf32>,
    %111 = vector.extract_strided_slice %4 {offsets = [0, 896], sizes = [16, 128], strides = [1, 1]} : vector<16x1024xf32> to vector<16x128xf32>
    %cst_37 = arith.constant dense<0xFF800000> : vector<16xf32>
    %112 = vector.multi_reduction <maximumf>, %111, %cst_37 [1] : vector<16x128xf32> to vector<16xf32>
    %113 = vector.shape_cast %112 : vector<16xf32> to vector<16x1xf32>
    %114 = vector.broadcast %113 : vector<16x1xf32> to vector<16x128xf32>
    %115 = arith.subf %111, %114 : vector<16x128xf32>
    %116 = math.exp %115 : vector<16x128xf32>
    %cst_38 = arith.constant dense<0.000000e+00> : vector<16xf32>
    %117 = vector.multi_reduction <add>, %116, %cst_38 [1] : vector<16x128xf32> to vector<16xf32>
    %118 = vector.shape_cast %117 : vector<16xf32> to vector<16x1xf32>
    %119 = tpu.reciprocal %118 : vector<16x1xf32> -> vector<16x1xf32>
    %120 = vector.broadcast %119 : vector<16x1xf32> to vector<16x128xf32>
    %121 = arith.mulf %116, %120 : vector<16x128xf32>
    %122 = vector.extract_strided_slice %5 {offsets = [0, 896], sizes = [16, 128], strides = [1, 1]} : vector<16x1024xf32> to vector<16x128xf32>
    %123 = arith.addf %122, %3 : vector<16x128xf32>
    %cst_39 = arith.constant dense<0.000000e+00> : vector<16x16xf32>
    %124 = tpu.matmul %123, %121, %cst_39 {dimension_numbers = #tpu.dot_dimension_numbers<[1], [1], [0], [0], [0, 0, 1, 0], [], []>} : vector<16x128xf32>, vector<16x128xf32>, vector<16x16xf32> -> vector<16x16xf32>
    %c0_40 = arith.constant 0 : index
    %c112 = arith.constant 112 : index
    %125 = vector.load %arg5[%c0_40, %c112] : memref<16x128xf32, #tpu.memory_space<vmem>>, vector<16x16xf32>
    tpu.vector_store %arg5[%c0_40, %c112], %124 {strides = array<i32>} : memref<16x128xf32, #tpu.memory_space<vmem>>, vector<16x16xf32>,
    return
  }
  func.func @transform_0(%arg0: i32) -> (i32, i32) {
    %c0_i32 = arith.constant 0 : i32
    %c0_i32_0 = arith.constant 0 : i32
    return %c0_i32, %arg0 : i32, i32
  }
  func.func @transform_1(%arg0: i32) -> (i32, i32) {
    %c0_i32 = arith.constant 0 : i32
    %c0_i32_0 = arith.constant 0 : i32
    %c0_i32_1 = arith.constant 0 : i32
    return %c0_i32, %c0_i32_0 : i32, i32
  }
  func.func @transform_2(%arg0: i32) -> (i32, i32) {
    %c0_i32 = arith.constant 0 : i32
    %c0_i32_0 = arith.constant 0 : i32
    %c0_i32_1 = arith.constant 0 : i32
    return %c0_i32, %c0_i32_0 : i32, i32
  }
  func.func @transform_3(%arg0: i32) -> (i32, i32) {
    %c0_i32 = arith.constant 0 : i32
    %c0_i32_0 = arith.constant 0 : i32
    %c0_i32_1 = arith.constant 0 : i32
    return %c0_i32, %c0_i32_0 : i32, i32
  }
  func.func @transform_4(%arg0: i32) -> (i32, i32) {
    %c0_i32 = arith.constant 0 : i32
    %c0_i32_0 = arith.constant 0 : i32
    return %c0_i32, %arg0 : i32, i32
  }
}

</mosaic_0001>

<bundles_post_ra>
// kernel: static_tokenizer.1
= control target key start
LH: loop header
LB: loop body
LE: loop exit
PB: predicated region body
PF: predicated region fallthrough
CT: control target
= control target key end

     0   :  { %s2042_s15 = smov 0   ;;  %s2044_s16 = smov 0   ;;  %s2254_s0 = inlined_call_operand.vmem [shape: f32[8,2048], index: 0, kind: input, shape index: {}]   ;;  %s2255_s1 = inlined_call_operand.vmem [shape: f32[16,8], index: 1, kind: input, shape index: {}]   ;;  %s2256_s2 = inlined_call_operand.vmem [shape: f32[16,8], index: 2, kind: input, shape index: {}]   ;;  %s2257_s3 = inlined_call_operand.vmem [shape: f32[16,128], index: 3, kind: input, shape index: {}]   ;;  %s2258_s4 = inlined_call_operand.vmem [shape: f32[16,256], index: 4, kind: output, shape index: {}]  }
   0x1   :  { %s2046_s17 = smov 0  }
   0x2 LB: > { %s1773_s18 = sadd.s32 4294967295, %s2007_s17   ;;  %s2055_s19 = sadd.s32 1, %s2007_s17   ;;  %s2007_s17 = sphi %s2046_s17, %s2262_s17   ;;  %s2003_s16 = sphi %s2044_s16, %s2261_s16   ;;  %s1999_s15 = sphi %s2042_s15, %s2260_s15  }
   0x3   : > { %s107_s20 = ssub.s32 %s2007_s17, %s2055_s19  ;;  %s110_s21 = sadd.s32 1, %s2003_s16 }
   0x4   : > { %p108_p0 = scmp.eq.s32.totalorder %s107_s20, 0  ;;  %p120_p1 = scmp.ne.s32.totalorder %s2003_s16, %s1999_s15 }
   0x5   : > { %p121_p2 = scmp.eq.s32.totalorder %s1773_s18, 1  ;;  %p1777_p3 = scmp.ge.s32.totalorder %s2007_s17, 1 }
   0x6   : > { %s2062_s22 = scalar_select %p108_p0, %s2003_s16, %s110_s21  }
   0x7   : > { %p2064_p4 = por %p121_p2, %p120_p1  ;;  %p163_p5 = scmp.lt.s32.totalorder %s2007_s17, 3 }
   0x9   : > { %p164_p6 = pnand %p1777_p3, %p163_p5 }
   0xa   : > { %s2068_s24 = sshll.u32 (!%p164_p6), %s1773_s18, 3  ;;  %s185_s18 = sand.u32 (!%p164_p6), 1, %s1999_s15  }
   0xb   : > { %167 = sbr.rel (%p164_p6) target bundleno = 888 (0x378), region = 36  ;;  %p189_p7 = scmp.lt.s32.totalorder (!%p164_p6), %s2068_s24, 15 }
   0xc   : > { %s1778_s20 = sshll.u32 (!%p164_p6), %s185_s18, 4  ;;  %s2012_s15 = smov (!%p164_p6), 48  }
   0xd   : > { %s2218_s21 = scalar_lea.vmem (!%p164_p6), [#allocation2], %s1778_s20  ;;  %s2013_s27 = smov (!%p164_p6), 64  }
   0xe   : > { %s2014_s28 = smov (!%p164_p6), 80   ;;  %s2016_s30 = smov (!%p164_p6), 112  }
  0x10   : > { %v2009_v0 = vmov 0.0   ;;  %s190_s25 = scalar_select %p189_p7, %s2068_s24, 15  ;;  %v202_v1 = vld [vmem:[%s2255_s1] sm:$0xff]  ;;  %vm208_vm0 = vcmask 64512   ;;  %v203_v10 = vld [vmem:[%s2255_s1 + $0x8] sm:$0xff]  ;;  %vm932_vm1 = vcmask 130048  }
  0x11   : > { %279 = vmatprep.mubr.f32.mxu0 %v2009_v0  ;;  %356 = vmatprep.mubr.f32.mxu1 %v2009_v0  ;;  %v204_v11 = vld [vmem:[%s2256_s2] sm:$0xff]  ;;  %v205_v12 = vld [vmem:[%s2256_s2 + $0x8] sm:$0xff]  ;;  %vm1038_vm2 = vcmask 261248   ;;  %vm1144_vm3 = vcmask 392448   ;;  %vm1250_vm4 = vcmask 523648   ;;  %vm1356_vm5 = vcmask 654848   ;;  %s1685_s7 = scalar_lea.vmem (%p2064_p4), %s2258_s4, %s2068_s24 }
  0x12   : > { %s1780_s26 = sshll.u32 %s190_s25, 3  ;;  %s2010_s25 = smov 16   ;;  %vm1462_vm6 = vcmask 786048   ;;  %vm1568_vm7 = vcmask 917248   ;;  %vm1674_vm8 = vcmask 1048448  }
  0x13   : > { %s192_s29 = scalar_lea.vmem %s2254_s0, %s1780_s26  ;;  %s2011_s26 = smov 32  }
  0x14   : > { %v195_v2 = vld [vmem:[%s192_s29 + $0x8] sm:$0xff]  ;;  %v194_v3 = vld [vmem:[%s192_s29] sm:$0xff]  ;;  %v197_v4 = vld [vmem:[%s192_s29 + $0x18] sm:$0xff] }
  0x15   : > { %245 = vmatprep.subr.mxu0 %v195_v2  ;;  %322 = vmatprep.subr.mxu1 %v197_v4  ;;  %v196_v5 = vld [vmem:[%s192_s29 + $0x10] sm:$0xff]  ;;  %v199_v6 = vld [vmem:[%s192_s29 + $0x28] sm:$0xff]  ;;  %v201_v7 = vld [vmem:[%s192_s29 + $0x38] sm:$0xff] }
  0x16   : > { %246 = vmatpush1.msra.mxu0 %v194_v3  ;;  %323 = vmatpush1.msra.mxu1 %v196_v5  ;;  %v198_v8 = vld [vmem:[%s192_s29 + $0x20] sm:$0xff]  ;;  %v200_v9 = vld [vmem:[%s192_s29 + $0x30] sm:$0xff]  ;;  %s2015_s29 = smov 96  }
  0x17   : > { %1781 = vmatmul.mubr.msk.f32.vlgmr.msra.gmra.mxu0 %vm208_vm0, %v202_v1  ;;  %1783 = vmatmul.mubr.msk.f32.vlgmr.msra.gmra.mxu1 %vm208_vm0, %v202_v1 }
  0x18   : > { %285 = vmatprep.mubr.f32.mxu0 %v2009_v0  ;;  %362 = vmatprep.mubr.f32.mxu1 %v2009_v0 }
  0x19   : > { %399 = vmatprep.subr.mxu0 %v199_v6  ;;  %476 = vmatprep.subr.mxu1 %v201_v7 }
  0x1a   : > { %400 = vmatpush1.msra.mxu0 %v198_v8  ;;  %477 = vmatpush1.msra.mxu1 %v200_v9 }
  0x1b   : > { %1782 = vmatmul.mubr.msk.f32.gmra.mxu0 %vm208_vm0, %v203_v10  ;;  %1784 = vmatmul.mubr.msk.f32.gmra.mxu1 %vm208_vm0, %v203_v10 }
  0x1c   : > { %433 = vmatprep.mubr.f32.mxu0 %v2009_v0  ;;  %510 = vmatprep.mubr.f32.mxu1 %v2009_v0 }
  0x1d   : > { %559 = vmatprep.subr.mxu0 %v195_v2  ;;  %636 = vmatprep.subr.mxu1 %v197_v4 }
  0x1f   : > { %1785 = vmatmul.mubr.msk.f32.vlgmr.msra.gmra.mxu0 %vm208_vm0, %v202_v1  ;;  %1787 = vmatmul.mubr.msk.f32.vlgmr.msra.gmra.mxu1 %vm208_vm0, %v202_v1 }
  0x20   : > { %439 = vmatprep.mubr.f32.mxu0 %v2009_v0  ;;  %516 = vmatprep.mubr.f32.mxu1 %v2009_v0 }
  0x21   : > { %560 = vmatpush1.msra.mxu0 %v194_v3  ;;  %637 = vmatpush1.msra.mxu1 %v196_v5 }
  0x22   : > { %713 = vmatprep.subr.mxu0 %v199_v6  ;;  %790 = vmatprep.subr.mxu1 %v201_v7 }
  0x23   : > { %1786 = vmatmul.mubr.msk.f32.gmra.mxu0 %vm208_vm0, %v203_v10  ;;  %1788 = vmatmul.mubr.msk.f32.gmra.mxu1 %vm208_vm0, %v203_v10 }
  0x24   : > { %593 = vmatprep.mubr.f32.mxu0 %v2009_v0  ;;  %670 = vmatprep.mubr.f32.mxu1 %v2009_v0 }
  0x27   : > { %1789 = vmatmul.mubr.msk.f32.vlgmr.msra.gmra.mxu0 %vm208_vm0, %v204_v11  ;;  %1791 = vmatmul.mubr.msk.f32.vlgmr.msra.gmra.mxu1 %vm208_vm0, %v204_v11 }
  0x28   : > { %599 = vmatprep.mubr.f32.mxu0 %v2009_v0  ;;  %676 = vmatprep.mubr.f32.mxu1 %v2009_v0 }
  0x29   : > { %714 = vmatpush1.msra.mxu0 %v198_v8  ;;  %791 = vmatpush1.msra.mxu1 %v200_v9 }
  0x2b   : > { %1790 = vmatmul.mubr.msk.f32.gmra.mxu0 %vm208_vm0, %v205_v12  ;;  %1792 = vmatmul.mubr.msk.f32.gmra.mxu1 %vm208_vm0, %v205_v12 }
  0x2c   : > { %747 = vmatprep.mubr.f32.mxu0 %v2009_v0  ;;  %824 = vmatprep.mubr.f32.mxu1 %v2009_v0 }
  0x2f   : > { %1793 = vmatmul.mubr.msk.f32.vlgmr.msra.gmra.mxu0 %vm208_vm0, %v204_v11  ;;  %1795 = vmatmul.mubr.msk.f32.vlgmr.msra.gmra.mxu1 %vm208_vm0, %v204_v11 }
  0x30   : > { %753 = vmatprep.mubr.f32.mxu0 %v2009_v0  ;;  %830 = vmatprep.mubr.f32.mxu1 %v2009_v0 }
  0x33   : > { %1794 = vmatmul.mubr.msk.f32.gmra.mxu0 %vm208_vm0, %v205_v12  ;;  %1796 = vmatmul.mubr.msk.f32.gmra.mxu1 %vm208_vm0, %v205_v12 }
  0xd7   : > { %v281_v13 = vpop.f32.mrf.mxu0  ;;  %v358_v14 = vpop.f32.mrf.mxu1 }
  0xd8   : > { %837 = vmax.xlane.f32.xlu1 %v281_v13 }
  0xd9   : > { %v283_v15 = vpop.f32.mrf.mxu0  ;;  %v360_v16 = vpop.f32.mrf.mxu1 }
  0xdb   : > { %v287_v17 = vpop.f32.mrf.mxu0  ;;  %v364_v18 = vpop.f32.mrf.mxu1 }
  0xdc   : > { %935 = vmax.xlane.f32.xlu1 %v283_v15  ;;  %839 = vmax.xlane.f32.xlu0 %v287_v17 }
  0xdd   : > { %v289_v19 = vpop.f32.mrf.mxu0  ;;  %v366_v20 = vpop.f32.mrf.mxu1 }
  0xdf   : > { %v2103_v21 = vpop.f32.mrf.mxu0  ;;  %v2107_v23 = vpop.f32.mrf.mxu1 }
  0xe0   : > { %1149 = vmax.xlane.f32.xlu1 %v366_v20  ;;  %937 = vmax.xlane.f32.xlu0 %v289_v19 }
  0xe1   : > { %v2105_v22 = vpop.f32.mrf.mxu0  ;;  %v2109_v26 = vpop.f32.mrf.mxu1 }
  0xe3   : > { %v441_v24 = vpop.f32.mrf.mxu0  ;;  %v2111_v27 = vpop.f32.mrf.mxu1 }
  0xe4   : > { %1147 = vmax.xlane.f32.xlu1 %v360_v16  ;;  %1043 = vmax.xlane.f32.xlu0 %v364_v18 }
  0xe5   : > { %v443_v25 = vpop.f32.mrf.mxu0  ;;  %v2114_v28 = vpop.f32.mrf.mxu1 }
  0xe8   : > { %1041 = vmax.xlane.f32.xlu0 %v358_v14  ;;  %1361 = vmax.xlane.f32.xlu1 %v443_v25 }
  0xec   : > { %1255 = vmax.xlane.f32.xlu0 %v441_v24  ;;  %1359 = vmax.xlane.f32.xlu1 %v2105_v22 }
  0xf0   : > { %1253 = vmax.xlane.f32.xlu0 %v2103_v21  ;;  %1573 = vmax.xlane.f32.xlu1 %v2114_v28 }
  0xf4   : > { %1467 = vmax.xlane.f32.xlu0 %v2111_v27  ;;  %1571 = vmax.xlane.f32.xlu1 %v2109_v26 }
  0xf8   : > { %1465 = vmax.xlane.f32.xlu0 %v2107_v23 }
 0x161   : > { %v838_v29 = vpop.xlane.xlu1 %837 }
 0x162   : > { %v841_v32 = vsub.f32 %v281_v13, %v838_v29  ;;  %v595_v29 = vpop.f32.mrf.mxu0 }
 0x164   : > { %v843_v37 = vmul.f32 1.442695, %v841_v32 }
 0x165   : > { %v936_v30 = vpop.xlane.xlu1 %935  ;;  %v840_v31 = vpop.xlane.xlu0 %839 }
 0x166   : > { %v842_v33 = vsub.f32 %v287_v17, %v840_v31  ;;  %v939_v38 = vsub.f32 %v283_v15, %v936_v30  ;;  %v597_v31 = vpop.f32.mrf.mxu0 }
 0x168   : > { %v845_v34 = vmul.f32 1.442695, %v842_v33  ;;  %v941_v43 = vmul.f32 1.442695, %v939_v38 }
 0x169   : > { %v1150_v35 = vpop.xlane.xlu1 %1149  ;;  %v938_v36 = vpop.xlane.xlu0 %937 }
 0x16a   : > { %v940_v39 = vsub.f32 %v289_v19, %v938_v36  ;;  %1921 = vpow2.f32 %v845_v34  ;;  %v1152_v45 = vsub.f32 %v366_v20, %v1150_v35 }
 0x16b   : > { %1923 = vpow2.f32 %v843_v37 }
 0x16c   : > { %v943_v40 = vmul.f32 1.442695, %v940_v39  ;;  %v1155_v50 = vmul.f32 1.442695, %v1152_v45 }
 0x16d   : > { %v1148_v41 = vpop.xlane.xlu1 %1147  ;;  %v1044_v42 = vpop.xlane.xlu0 %1043 }
 0x16e   : > { %v1046_v44 = vsub.f32 %v364_v18, %v1044_v42  ;;  %1925 = vpow2.f32 %v943_v40  ;;  %v1151_v51 = vsub.f32 %v360_v16, %v1148_v41 }
 0x16f   : > { %1927 = vpow2.f32 %v941_v43 }
 0x170   : > { %v1049_v46 = vmul.f32 1.442695, %v1046_v44  ;;  %v1153_v56 = vmul.f32 1.442695, %v1151_v51 }
 0x171   : > { %v1042_v47 = vpop.xlane.xlu0 %1041  ;;  %v1362_v48 = vpop.xlane.xlu1 %1361 }
 0x172   : > { %v1045_v49 = vsub.f32 %v358_v14, %v1042_v47  ;;  %1929 = vpow2.f32 %v1049_v46  ;;  %v1364_v57 = vsub.f32 %v443_v25, %v1362_v48  ;;  %v2186_v46 = vld [vmem:[%s2257_s3 + $0x8] sm:$0xff]  ;;  %v601_v47 = vpop.f32.mrf.mxu0 }
 0x174   : > { %v1047_v52 = vmul.f32 1.442695, %v1045_v49  ;;  %v1367_v0 = vmul.f32 1.442695, %v1364_v57 }
 0x175   : > { %v1256_v53 = vpop.xlane.xlu0 %1255  ;;  %v1360_v54 = vpop.xlane.xlu1 %1359 }
 0x176   : > { %1931 = vpow2.f32 %v1047_v52  ;;  %v1258_v55 = vsub.f32 %v441_v24, %v1256_v53  ;;  %v1363_v1 = vsub.f32 %v2105_v22, %v1360_v54  ;;  %v856_v53 = vadd.f32 %v601_v47, %v2186_v46  ;;  %v672_v54 = vpop.f32.mrf.mxu1 }
 0x177   : > { %1933 = vpow2.f32 %v1155_v50  ;;  %v2121_v58 = vpop.eup %1921 }
 0x178   : > { %v1261_v59 = vmul.f32 1.442695, %v1258_v55  ;;  %849 = vadd.xlane.f32.xlu0 %v2121_v58  ;;  %v2125_v63 = vpop.eup %1923  ;;  %v1365_v7 = vmul.f32 1.442695, %v1363_v1 }
 0x179   : > { %v1254_v60 = vpop.xlane.xlu0 %1253  ;;  %v1574_v62 = vpop.xlane.xlu1 %1573 }
 0x17a   : > { %1935 = vpow2.f32 %v1261_v59  ;;  %v1257_v61 = vsub.f32 %v2103_v21, %v1254_v60  ;;  %v1576_v8 = vsub.f32 %v2114_v28, %v1574_v62  ;;  %v2173_v28 = vld [vmem:[%s2257_s3] sm:$0xff]  ;;  %v603_v62 = vpop.f32.mrf.mxu0 }
 0x17b   : > { %1937 = vpow2.f32 %v1153_v56  ;;  %v2128_v2 = vpop.eup %1925  ;;  %v855_v30 = vadd.f32 %v595_v29, %v2173_v28  ;;  %v953_v32 = vadd.f32 %v597_v31, %v2173_v28  ;;  %v1059_v57 = vadd.f32 %v672_v54, %v2173_v28 }
 0x17c   : > { %v1259_v3 = vmul.f32 1.442695, %v1257_v61  ;;  %847 = vadd.xlane.f32.xlu0 %v2125_v63  ;;  %947 = vadd.xlane.f32.xlu1 %v2128_v2  ;;  %v2133_v6 = vpop.eup %1927  ;;  %v1579_v15 = vmul.f32 1.442695, %v1576_v8 }
 0x17d   : > { %v1468_v4 = vpop.xlane.xlu0 %1467  ;;  %v1572_v11 = vpop.xlane.xlu1 %1571  ;;  %1837 = vmatprep.mubr.f32.mxu0 %v855_v30  ;;  %1844 = vmatprep.mubr.f32.mxu1 %v953_v32 }
 0x17e   : > { %1939 = vpow2.f32 %v1259_v3  ;;  %v1470_v5 = vsub.f32 %v2111_v27, %v1468_v4  ;;  %v1575_v16 = vsub.f32 %v2109_v26, %v1572_v11  ;;  %v749_v3 = vpop.f32.mrf.mxu0  ;;  %v954_v4 = vadd.f32 %v603_v62, %v2186_v46 }
 0x17f   : > { %1941 = vpow2.f32 %v1367_v0  ;;  %v2136_v9 = vpop.eup %1929 }
 0x180   : > { %v1473_v10 = vmul.f32 1.442695, %v1470_v5  ;;  %1053 = vadd.xlane.f32.xlu0 %v2136_v9  ;;  %945 = vadd.xlane.f32.xlu1 %v2133_v6  ;;  %v1577_v20 = vmul.f32 1.442695, %v1575_v16 }
 0x181   : > { %v1466_v12 = vpop.xlane.xlu0 %1465 }
 0x182   : > { %1943 = vpow2.f32 %v1473_v10  ;;  %v1469_v13 = vsub.f32 %v2107_v23, %v1466_v12 }
 0x183   : > { %v2141_v14 = vpop.eup %1931  ;;  %1945 = vpow2.f32 %v1365_v7 }
 0x184   : > { %v2144_v17 = vpop.eup %1933  ;;  %v1471_v18 = vmul.f32 1.442695, %v1469_v13  ;;  %1051 = vadd.xlane.f32.xlu0 %v2141_v14 }
 0x185   : > { %1159 = vadd.xlane.f32.xlu1 %v2144_v17 }
 0x186   : > { %1947 = vpow2.f32 %v1471_v18 }
 0x187   : > { %v2148_v19 = vpop.eup %1935  ;;  %1949 = vpow2.f32 %v1579_v15 }
 0x188   : > { %v2150_v21 = vpop.eup %1937  ;;  %1265 = vadd.xlane.f32.xlu0 %v2148_v19  ;;  %1951 = vpow2.f32 %v1577_v20 }
 0x189   : > { %1157 = vadd.xlane.f32.xlu1 %v2150_v21 }
 0x18b   : > { %v2154_v22 = vpop.eup %1939 }
 0x18c   : > { %v2156_v23 = vpop.eup %1941  ;;  %1263 = vadd.xlane.f32.xlu0 %v2154_v22 }
 0x18d   : > { %1371 = vadd.xlane.f32.xlu1 %v2156_v23 }
 0x18f   : > { %v2160_v24 = vpop.eup %1943 }
 0x190   : > { %v2162_v25 = vpop.eup %1945  ;;  %1477 = vadd.xlane.f32.xlu0 %v2160_v24 }
 0x191   : > { %1369 = vadd.xlane.f32.xlu1 %v2162_v25 }
 0x193   : > { %v2166_v26 = vpop.eup %1947 }
 0x194   : > { %v2168_v27 = vpop.eup %1949  ;;  %1475 = vadd.xlane.f32.xlu0 %v2166_v26 }
 0x195   : > { %1583 = vadd.xlane.f32.xlu1 %v2168_v27  ;;  %v2179_v33 = vpop.eup %1951 }
 0x199   : > { %1581 = vadd.xlane.f32.xlu1 %v2179_v33 }
 0x201   : > { %v850_v34 = vpop.xlane.xlu0 %849 }
 0x202   : > { %1953 = vrcp.f32 %v850_v34 }
 0x205   : > { %v848_v35 = vpop.xlane.xlu0 %847  ;;  %v948_v36 = vpop.xlane.xlu1 %947 }
 0x206   : > { %1955 = vrcp.f32 %v848_v35 }
 0x207   : > { %1957 = vrcp.f32 %v948_v36 }
 0x209   : > { %v1054_v37 = vpop.xlane.xlu0 %1053  ;;  %v946_v38 = vpop.xlane.xlu1 %945 }
 0x20a   : > { %1959 = vrcp.f32 %v1054_v37 }
 0x20b   : > { %1961 = vrcp.f32 %v946_v38 }
 0x20d   : > { %v1052_v39 = vpop.xlane.xlu0 %1051 }
 0x20e   : > { %v1160_v40 = vpop.xlane.xlu1 %1159  ;;  %1963 = vrcp.f32 %v1052_v39 }
 0x20f   : > { %v1954_v41 = vpop.eup %1953  ;;  %1965 = vrcp.f32 %v1160_v40 }
 0x210   : > { %v854_v42 = vmul.f32 %v1954_v41, %v2121_v58 }
 0x211   : > { %v1266_v43 = vpop.xlane.xlu0 %1265 }
 0x212   : > { %v1158_v44 = vpop.xlane.xlu1 %1157  ;;  %1967 = vrcp.f32 %v1266_v43  ;;  %1833 = vmatprep.subr.mxu0 %v854_v42 }
 0x213   : > { %v1956_v45 = vpop.eup %1955  ;;  %1969 = vrcp.f32 %v1158_v44  ;;  %1834 = vmatpush3.xpose.msra.mxu0 %v854_v42 }
 0x214   : > { %v1958_v48 = vpop.eup %1957  ;;  %v853_v49 = vmul.f32 %v1956_v45, %v2125_v63  ;;  %v674_v63 = vpop.f32.mrf.mxu1 }
 0x215   : > { %v1264_v50 = vpop.xlane.xlu0 %1263  ;;  %v952_v52 = vmul.f32 %v1958_v48, %v2128_v2  ;;  %v1165_v5 = vadd.f32 %v674_v63, %v2173_v28 }
 0x216   : > { %v1372_v51 = vpop.xlane.xlu1 %1371  ;;  %1971 = vrcp.f32 %v1264_v50  ;;  %1835 = vmatprep.subr.mxu0 %v853_v49 }
 0x217   : > { %v1960_v55 = vpop.eup %1959  ;;  %1973 = vrcp.f32 %v1372_v51  ;;  %1840 = vmatprep.subr.mxu1 %v952_v52  ;;  %1836 = vmatpush3.xpose.msra.mxu0 %v853_v49 }
 0x218   : > { %v1962_v56 = vpop.eup %1961  ;;  %1841 = vmatpush3.xpose.msra.mxu1 %v952_v52  ;;  %v1058_v58 = vmul.f32 %v1960_v55, %v2136_v9  ;;  %v678_v9 = vpop.f32.mrf.mxu1 }
 0x219   : > { %v1478_v59 = vpop.xlane.xlu0 %1477  ;;  %v951_v61 = vmul.f32 %v1962_v56, %v2133_v6  ;;  %v1060_v11 = vadd.f32 %v678_v9, %v2186_v46 }
 0x21a   : > { %v1370_v60 = vpop.xlane.xlu1 %1369  ;;  %1975 = vrcp.f32 %v1478_v59  ;;  %1838 = vmatmul.mubr.f32.vlgmr.msra.gmra.mxu0 %v856_v53  ;;  %1847 = vmatprep.subr.mxu0 %v1058_v58  ;;  %v680_v18 = vpop.f32.mrf.mxu1 }
 0x21b   : > { %v1964_v0 = vpop.eup %1963  ;;  %1977 = vrcp.f32 %v1370_v60  ;;  %1842 = vmatprep.subr.mxu1 %v951_v61  ;;  %1848 = vmatpush3.xpose.msra.mxu0 %v1058_v58  ;;  %v1166_v32 = vadd.f32 %v680_v18, %v2186_v46 }
 0x21c   : > { %v1966_v1 = vpop.eup %1965  ;;  %1843 = vmatpush3.xpose.msra.mxu1 %v951_v61  ;;  %v1057_v2 = vmul.f32 %v1964_v0, %v2141_v14  ;;  %1851 = vmatprep.mubr.f32.mxu0 %v1059_v57  ;;  %v751_v14 = vpop.f32.mrf.mxu0 }
 0x21d   : > { %v1476_v6 = vpop.xlane.xlu0 %1475  ;;  %v1164_v8 = vmul.f32 %v1966_v1, %v2144_v17  ;;  %v1271_v17 = vadd.f32 %v749_v3, %v2173_v28  ;;  %v1377_v34 = vadd.f32 %v751_v14, %v2173_v28 }
 0x21e   : > { %v1584_v7 = vpop.xlane.xlu1 %1583  ;;  %1979 = vrcp.f32 %v1476_v6  ;;  %1849 = vmatprep.subr.mxu0 %v1057_v2  ;;  %v755_v31 = vpop.f32.mrf.mxu0 }
 0x21f   : > { %v1968_v10 = vpop.eup %1967  ;;  %1981 = vrcp.f32 %v1584_v7  ;;  %1845 = vmatmul.mubr.f32.vlgmr.msra.gmra.mxu1 %v954_v4  ;;  %1854 = vmatprep.subr.mxu1 %v1164_v8  ;;  %v1272_v36 = vadd.f32 %v755_v31, %v2186_v46 }
 0x220   : > { %v1970_v12 = vpop.eup %1969  ;;  %1850 = vmatpush3.xpose.msra.mxu0 %v1057_v2  ;;  %1855 = vmatpush3.xpose.msra.mxu1 %v1164_v8  ;;  %v1270_v13 = vmul.f32 %v1968_v10, %v2148_v19  ;;  %v826_v19 = vpop.f32.mrf.mxu1 }
 0x221   : > { %1858 = vmatprep.mubr.f32.mxu1 %v1165_v5  ;;  %v1163_v16 = vmul.f32 %v1970_v12, %v2150_v21  ;;  %v1483_v40 = vadd.f32 %v826_v19, %v2173_v28  ;;  %v757_v41 = vpop.f32.mrf.mxu0 }
 0x222   : > { %v1582_v15 = vpop.xlane.xlu1 %1581  ;;  %1861 = vmatprep.subr.mxu0 %v1270_v13  ;;  %v828_v38 = vpop.f32.mrf.mxu1  ;;  %v1378_v45 = vadd.f32 %v757_v41, %v2186_v46 }
 0x223   : > { %1983 = vrcp.f32 %v1582_v15  ;;  %v1972_v20 = vpop.eup %1971  ;;  %1852 = vmatmul.mubr.f32.vlgmr.msra.gmra.mxu0 %v1060_v11  ;;  %1856 = vmatprep.subr.mxu1 %v1163_v16 }
 0x224   : > { %v1974_v29 = vpop.eup %1973  ;;  %1857 = vmatpush3.xpose.msra.mxu1 %v1163_v16  ;;  %1862 = vmatpush3.xpose.msra.mxu0 %v1270_v13  ;;  %v1269_v30 = vmul.f32 %v1972_v20, %v2154_v22  ;;  %v832_v44 = vpop.f32.mrf.mxu1 }
 0x225   : > { %v1376_v21 = vmul.f32 %v1974_v29, %v2156_v23  ;;  %1865 = vmatprep.mubr.f32.mxu0 %v1271_v17  ;;  %v1484_v48 = vadd.f32 %v832_v44, %v2186_v46 }
 0x226   : > { %1863 = vmatprep.subr.mxu0 %v1269_v30 }
 0x227   : > { %v1976_v35 = vpop.eup %1975  ;;  %1859 = vmatmul.mubr.f32.vlgmr.msra.gmra.mxu1 %v1166_v32  ;;  %1868 = vmatprep.subr.mxu1 %v1376_v21 }
 0x228   : > { %v1978_v37 = vpop.eup %1977  ;;  %1864 = vmatpush3.xpose.msra.mxu0 %v1269_v30  ;;  %1869 = vmatpush3.xpose.msra.mxu1 %v1376_v21  ;;  %v1482_v22 = vmul.f32 %v1976_v35, %v2160_v24  ;;  %v1589_v24 = vadd.f32 %v828_v38, %v2173_v28 }
 0x229   : > { %1872 = vmatprep.mubr.f32.mxu1 %v1377_v34  ;;  %v1375_v39 = vmul.f32 %v1978_v37, %v2162_v25 }
 0x22a   : > { %1875 = vmatprep.subr.mxu0 %v1482_v22 }
 0x22b   : > { %v1980_v23 = vpop.eup %1979  ;;  %1866 = vmatmul.mubr.f32.vlgmr.msra.gmra.mxu0 %v1272_v36  ;;  %1870 = vmatprep.subr.mxu1 %v1375_v39 }
 0x22c   : > { %v1982_v42 = vpop.eup %1981  ;;  %1871 = vmatpush3.xpose.msra.mxu1 %v1375_v39  ;;  %1876 = vmatpush3.xpose.msra.mxu0 %v1482_v22  ;;  %v1481_v43 = vmul.f32 %v1980_v23, %v2166_v26  ;;  %v834_v26 = vpop.f32.mrf.mxu1 }
 0x22d   : > { %v1588_v47 = vmul.f32 %v1982_v42, %v2168_v27  ;;  %1879 = vmatprep.mubr.f32.mxu0 %v1483_v40  ;;  %v1590_v28 = vadd.f32 %v834_v26, %v2186_v46 }
 0x22e   : > { %1877 = vmatprep.subr.mxu0 %v1481_v43 }
 0x22f   : > { %1873 = vmatmul.mubr.f32.vlgmr.msra.gmra.mxu1 %v1378_v45  ;;  %1882 = vmatprep.subr.mxu1 %v1588_v47 }
 0x230   : > { %v1984_v25 = vpop.eup %1983  ;;  %1878 = vmatpush3.xpose.msra.mxu0 %v1481_v43  ;;  %1883 = vmatpush3.xpose.msra.mxu1 %v1588_v47 }
 0x231   : > { %v1587_v49 = vmul.f32 %v1984_v25, %v2179_v33  ;;  %1886 = vmatprep.mubr.f32.mxu1 %v1589_v24 }
 0x233   : > { %1884 = vmatprep.subr.mxu1 %v1587_v49  ;;  %1880 = vmatmul.mubr.f32.vlgmr.msra.gmra.mxu0 %v1484_v48 }
 0x234   : > { %1885 = vmatpush3.xpose.msra.mxu1 %v1587_v49 }
 0x237   : > { %1887 = vmatmul.mubr.f32.vlgmr.msra.gmra.mxu1 %v1590_v28 }
 0x2da   : > { %v1839_v27 = vpop.f32.mrf.mxu0 }
 0x2db   : > { %934 = vst.msk [vmem:[%s2218_s21 + $0x8] sm:$0xff] %vm932_vm1, %v1839_v27 }
 0x2dc   : > { %v923_v50 = vpop.f32.mrf.mxu0 }
 0x2dd   : > { %933 = vst.msk [vmem:[%s2218_s21] sm:$0xff] %vm932_vm1, %v923_v50 }
 0x2df   : > { %v1846_v33 = vpop.f32.mrf.mxu1 }
 0x2e0   : > { %1034 = vrot.lane.b32.xlu1 %v1846_v33, %s2010_s25 }
 0x2e1   : > { %v1021_v51 = vpop.f32.mrf.mxu1 }
 0x2e2   : > { %1032 = vrot.lane.b32.xlu0 %v1021_v51, %s2010_s25 }
 0x2e3   : > { %v1853_v52 = vpop.f32.mrf.mxu0 }
 0x2e4   : > { %1140 = vrot.lane.b32.xlu1 %v1853_v52, %s2011_s26 }
 0x2e5   : > { %v1127_v46 = vpop.f32.mrf.mxu0 }
 0x2e7   : > { %v1860_v53 = vpop.f32.mrf.mxu1 }
 0x2e8   : > { %1138 = vrot.lane.b32.xlu1 %v1127_v46, %s2011_s26 }
 0x2e9   : > { %v1233_v54 = vpop.f32.mrf.mxu1 }
 0x2ea   : > { %1244 = vrot.lane.b32.xlu0 %v1233_v54, %s2012_s15 }
 0x2eb   : > { %v1867_v55 = vpop.f32.mrf.mxu0 }
 0x2ec   : > { %1246 = vrot.lane.b32.xlu1 %v1860_v53, %s2012_s15 }
 0x2ed   : > { %v1339_v56 = vpop.f32.mrf.mxu0 }
 0x2ee   : > { %1350 = vrot.lane.b32.xlu0 %v1339_v56, %s2013_s27 }
 0x2ef   : > { %v1874_v57 = vpop.f32.mrf.mxu1 }
 0x2f0   : > { %1352 = vrot.lane.b32.xlu1 %v1867_v55, %s2013_s27 }
 0x2f1   : > { %v1445_v58 = vpop.f32.mrf.mxu1 }
 0x2f2   : > { %1456 = vrot.lane.b32.xlu0 %v1445_v58, %s2014_s28 }
 0x2f3   : > { %v1881_v59 = vpop.f32.mrf.mxu0 }
 0x2f4   : > { %1458 = vrot.lane.b32.xlu1 %v1874_v57, %s2014_s28 }
 0x2f5   : > { %v1551_v60 = vpop.f32.mrf.mxu0 }
 0x2f6   : > { %1562 = vrot.lane.b32.xlu0 %v1551_v60, %s2015_s29 }
 0x2f7   : > { %v1888_v61 = vpop.f32.mrf.mxu1 }
 0x2f8   : > { %1564 = vrot.lane.b32.xlu1 %v1881_v59, %s2015_s29 }
 0x2f9   : > { %v1657_v62 = vpop.f32.mrf.mxu1 }
 0x2fa   : > { %1668 = vrot.lane.b32.xlu0 %v1657_v62, %s2016_s30 }
 0x2fc   : > { %1670 = vrot.lane.b32.xlu1 %v1888_v61, %s2016_s30 }
 0x352   : > { %v1035_v63 = vpop.permute.xlu1 %1034 }
 0x353   : > { %1040 = vst.msk [vmem:[%s2218_s21 + $0x8] sm:$0xff] %vm1038_vm2, %v1035_v63 }
 0x354   : > { %v1033_v0 = vpop.permute.xlu0 %1032 }
 0x355   : > { %1039 = vst.msk [vmem:[%s2218_s21] sm:$0xff] %vm1038_vm2, %v1033_v0 }
 0x356   : > { %v1141_v1 = vpop.permute.xlu1 %1140 }
 0x357   : > { %1146 = vst.msk [vmem:[%s2218_s21 + $0x8] sm:$0xff] %vm1144_vm3, %v1141_v1 }
 0x35a   : > { %v1139_v2 = vpop.permute.xlu1 %1138 }
 0x35b   : > { %1145 = vst.msk [vmem:[%s2218_s21] sm:$0xff] %vm1144_vm3, %v1139_v2 }
 0x35c   : > { %v1245_v3 = vpop.permute.xlu0 %1244 }
 0x35d   : > { %1251 = vst.msk [vmem:[%s2218_s21] sm:$0xff] %vm1250_vm4, %v1245_v3 }
 0x35e   : > { %v1247_v4 = vpop.permute.xlu1 %1246 }
 0x35f   : > { %1252 = vst.msk [vmem:[%s2218_s21 + $0x8] sm:$0xff] %vm1250_vm4, %v1247_v4 }
 0x360   : > { %v1351_v5 = vpop.permute.xlu0 %1350 }
 0x361   : > { %1357 = vst.msk [vmem:[%s2218_s21] sm:$0xff] %vm1356_vm5, %v1351_v5 }
 0x362   : > { %v1353_v6 = vpop.permute.xlu1 %1352 }
 0x363   : > { %1358 = vst.msk [vmem:[%s2218_s21 + $0x8] sm:$0xff] %vm1356_vm5, %v1353_v6 }
 0x364   : > { %v1457_v7 = vpop.permute.xlu0 %1456 }
 0x365   : > { %1463 = vst.msk [vmem:[%s2218_s21] sm:$0xff] %vm1462_vm6, %v1457_v7 }
 0x366   : > { %v1459_v8 = vpop.permute.xlu1 %1458 }
 0x367   : > { %1464 = vst.msk [vmem:[%s2218_s21 + $0x8] sm:$0xff] %vm1462_vm6, %v1459_v8 }
 0x368   : > { %v1563_v9 = vpop.permute.xlu0 %1562 }
 0x369   : > { %1569 = vst.msk [vmem:[%s2218_s21] sm:$0xff] %vm1568_vm7, %v1563_v9 }
 0x36a   : > { %v1565_v10 = vpop.permute.xlu1 %1564 }
 0x36b   : > { %1570 = vst.msk [vmem:[%s2218_s21 + $0x8] sm:$0xff] %vm1568_vm7, %v1565_v10  ;;  %1683 = sbr.rel (!%p2064_p4) target bundleno = 888 (0x378), region = 40 }
 0x36c   : > { %v1669_v11 = vpop.permute.xlu0 %1668 }
 0x36d   : > { %1675 = vst.msk [vmem:[%s2218_s21] sm:$0xff] %vm1674_vm8, %v1669_v11 }
 0x36e   : > { %v1671_v12 = vpop.permute.xlu1 %1670 }
 0x36f   : > { %1676 = vst.msk [vmem:[%s2218_s21 + $0x8] sm:$0xff] %vm1674_vm8, %v1671_v12 }
 0x374   : > { %v1716_v13 = vld [vmem:[%s2218_s21] sm:$0xff] }
 0x375   : > { %1717 = vst [vmem:[%s1685_s7] sm:$0xff] %v1716_v13 }
 0x376   : > { %v1718_v14 = vld [vmem:[%s2218_s21 + $0x8] sm:$0xff] }
 0x377   : > { %1719 = vst [vmem:[%s1685_s7 + $0x10] sm:$0xff] %v1718_v14 }
 0x378 PF: > { %p11_p8 = scmp.ge.s32.totalorder %s2055_s19, 4   ;;  %s2260_s15 = smov %s2003_s16 }
 0x379   : > { %s2261_s16 = smov %s2062_s22  ;;  %s2262_s17 = smov %s2055_s19 }
 0x37a   :  { %13 = sbr.rel (!%p11_p8) target bundleno = 2 (0x2), region = 104 }

</bundles_post_ra>
